<compile_context>
chip_gen: v7x
topology: tpu7x:2x2x1
jax: 0.10.0
libtpu: 0.0.40
codegen_flags: <defaults>
</compile_context>

<pallas_src>
import functools

import jax
import jax.numpy as jnp
from jax.experimental import pallas as pl
from jax.experimental.pallas import tpu as pltpu

LN_EPS = 1e-5


def _round_up(n, m):
    return ((n + m - 1) // m) * m


def _gcn_fused_kernel(x_full_ref, gamma_ref, beta_ref, adj_ref, k_ref, x_blk_ref,
                      out_ref, *, n_real, inv_n):
    """One output-column block j of the fused GCN forward.

    x_full_ref: (Bp, Fp)  full flattened input (resident)   -> LN stats + normalize
    gamma_ref : (1, Fp)   LN scale, flattened, zero-padded  (resident)
    beta_ref  : (1, Fp)   LN shift, flattened, zero-padded  (resident)
    adj_ref   : (Bp, Bp)  adjacency, zero-padded            (resident)
    k_ref     : (Fp, Nb)  column block of the kron-lifted 1x1-conv weight (W^T (x) I_HW)
    x_blk_ref : (Bp, Nb)  column block of the input for the residual add
    out_ref   : (Bp, Nb)  column block of the output
    """
    x = x_full_ref[...].astype(jnp.float32)                       # (Bp, Fp)

    # --- LayerNorm stats over the real C*H*W features (two-pass, padded lanes masked) ---
    mean = jnp.sum(x, axis=1, keepdims=True) * inv_n
    col = jax.lax.broadcasted_iota(jnp.int32, x.shape, 1)
    centered = jnp.where(col < n_real, x - mean, 0.0)
    var = jnp.sum(centered * centered, axis=1, keepdims=True) * inv_n
    rstd = jax.lax.rsqrt(var + LN_EPS)

    # Padded feature columns have gamma = beta = 0  ->  xn = 0 there (keeps conv clean).
    xn = (x - mean) * rstd * gamma_ref[...] + beta_ref[...]        # (Bp, Fp)

    # 1x1 conv via the kron-lifted weight:  (Bp, Fp) @ (Fp, Nb)  on the MXU, f32.
    tmp = jnp.dot(xn, k_ref[...], preferred_element_type=jnp.float32)

    # Graph mixing over the batch:  (Bp, Bp) @ (Bp, Nb).
    mixed = jnp.dot(adj_ref[...], tmp, preferred_element_type=jnp.float32)

    # Residual uses the ORIGINAL (pre-norm) input, as in the PyTorch module.
    out_ref[...] = (mixed + x_blk_ref[...].astype(jnp.float32)).astype(out_ref.dtype)


def graph_convolution_forward(x_nchw, adj, conv_w, ln_gamma, ln_beta):
    """x_nchw: (B, C, H, W); adj: (B, B); conv_w: (C_out, C_in) (Conv2d weight squeezed);
    ln_gamma/ln_beta: (C, H, W). Returns (B, C, H, W)."""
    B, C, H, W = x_nchw.shape
    HW = H * W
    F = C * HW                              # flattened feature count per sample
    Bp = _round_up(B, 8)                    # sublane alignment
    Fp = _round_up(F, 128)                  # lane alignment -> lane-dense loads/stores
    NB = 128                                # output column block (2 blocks -> 2 TCs on v7x)
    n_blocks = Fp // NB

    # Channel-flat activations, matching tmp.view(batch, -1) ordering (c*HW + hw).
    x_flat = jnp.pad(x_nchw.reshape(B, F), ((0, Bp - B), (0, Fp - F)))
    gamma = jnp.pad(ln_gamma.astype(jnp.float32).reshape(1, F), ((0, 0), (0, Fp - F)))
    beta = jnp.pad(ln_beta.astype(jnp.float32).reshape(1, F), ((0, 0), (0, Fp - F)))

    # Kron-lifted 1x1-conv weight:  tmp_flat = xn_flat @ (W^T (x) I_HW).
    k = jnp.kron(conv_w.astype(jnp.float32).T, jnp.eye(HW, dtype=jnp.float32))
    k = jnp.pad(k, ((0, Fp - F), (0, Fp - F)))

    # Padded adjacency rows/cols MUST stay zero so padded batch rows produce zeros.
    adj_p = jnp.pad(adj.astype(jnp.float32), ((0, Bp - B), (0, Bp - B)))

    kernel = functools.partial(_gcn_fused_kernel, n_real=F, inv_n=1.0 / float(F))

    flops = 2 * Bp * Fp * Fp + 2 * Bp * Bp * Fp
    bytes_accessed = (2 * Bp * Fp        # x (resident + residual blocks)
                      + Fp * Fp          # kron conv weight
                      + 2 * Fp           # gamma, beta
                      + Bp * Bp          # adjacency
                      + Bp * Fp) * 4     # output

    out_flat = pl.pallas_call(
        kernel,
        out_shape=jax.ShapeDtypeStruct((Bp, Fp), x_nchw.dtype),
        grid=(n_blocks,),
        in_specs=[
            pl.BlockSpec((Bp, Fp), lambda j: (0, 0)),   # x (full, resident): LN stats + normalize
            pl.BlockSpec((1, Fp), lambda j: (0, 0)),    # gamma (resident)
            pl.BlockSpec((1, Fp), lambda j: (0, 0)),    # beta (resident)
            pl.BlockSpec((Bp, Bp), lambda j: (0, 0)),   # adjacency (resident)
            pl.BlockSpec((Fp, NB), lambda j: (0, j)),   # kron conv-weight column block
            pl.BlockSpec((Bp, NB), lambda j: (0, j)),   # x column block for the residual
        ],
        out_specs=pl.BlockSpec((Bp, NB), lambda j: (0, j)),
        compiler_params=pltpu.CompilerParams(
            dimension_semantics=("parallel",)),         # 2 column blocks -> 2 TCs on v7x
        cost_estimate=pl.CostEstimate(flops=flops,
                                      transcendentals=Bp * n_blocks,
                                      bytes_accessed=bytes_accessed),
    )(x_flat, gamma, beta, adj_p, k, x_flat)

    return out_flat[:B, :F].reshape(B, C, H, W)


def _reference(x, adj, conv_w, ln_gamma, ln_beta):
    """Plain-JAX f32 reference mirroring the PyTorch forward, for validation."""
    B, C, H, W = x.shape
    xf = x.reshape(B, -1)
    mean = xf.mean(axis=1).reshape(B, 1, 1, 1)
    var = ((x - mean) ** 2).reshape(B, -1).mean(axis=1).reshape(B, 1, 1, 1)
    xn = (x - mean) / jnp.sqrt(var + LN_EPS)
    xn = xn * ln_gamma[None] + ln_beta[None]
    tmp = jnp.einsum("oc,bchw->bohw", conv_w, xn)
    out = (adj @ tmp.reshape(B, -1)).reshape(B, C, H, W) + x
    return out


if __name__ == "__main__":
    # Shapes consistent with the module: H = W = 7 forced by LayerNorm([C, 7, 7]);
    # in_features == out_features forced by the residual add.
    B, C, H, W = 8, 4, 7, 7

    key = jax.random.PRNGKey(0)
    kx, kadj, kw, kg, kb = jax.random.split(key, 5)

    x = jax.random.normal(kx, (B, C, H, W), dtype=jnp.float32)
    adj = jax.nn.softmax(jax.random.normal(kadj, (B, B), dtype=jnp.float32), axis=-1)
    conv_w = 0.01 * jax.random.normal(kw, (C, C), dtype=jnp.float32)   # Conv2d(C,C,1).weight[:, :, 0, 0]
    ln_gamma = 1.0 + 0.1 * jax.random.normal(kg, (C, H, W), dtype=jnp.float32)
    ln_beta = 0.05 * jax.random.normal(kb, (C, H, W), dtype=jnp.float32)

    out = graph_convolution_forward(x, adj, conv_w, ln_gamma, ln_beta)
    out = jax.block_until_ready(out)

    ref = _reference(x, adj, conv_w, ln_gamma, ln_beta)
    assert out.shape == (B, C, H, W)
    # All-f32 pipeline -> tight tolerance vs f32 reference.
    assert jnp.allclose(out, ref, rtol=1e-3, atol=1e-3), "Pallas result mismatch vs reference"

    print("KERNEL_OK")
</pallas_src>

<mosaic_0001>
module attributes {stable_mosaic.version = 11 : i64} {
  func.func @_gcn_fused_kernel(%arg0: i32, %arg1: memref<8x256xf32, #tpu.memory_space<vmem>>, %arg2: memref<1x256xf32, #tpu.memory_space<vmem>>, %arg3: memref<1x256xf32, #tpu.memory_space<vmem>>, %arg4: memref<8x8xf32, #tpu.memory_space<vmem>>, %arg5: memref<256x128xf32, #tpu.memory_space<vmem>>, %arg6: memref<8x128xf32, #tpu.memory_space<vmem>>, %arg7: memref<8x128xf32, #tpu.memory_space<vmem>>) attributes {dimension_semantics = [#tpu.dimension_semantics<parallel>], iteration_bounds = array<i64: 2>, scalar_prefetch = 0 : i64, scratch_operands = 0 : i64, tpu.core_type = #tpu.core_type<tc>, window_params = [{pipeline_mode = #tpu.pipeline_mode<synchronous>, transform_indices = @transform_0, window_bounds = array<i64: 8, 256>}, {pipeline_mode = #tpu.pipeline_mode<synchronous>, transform_indices = @transform_1, window_bounds = array<i64: 1, 256>}, {pipeline_mode = #tpu.pipeline_mode<synchronous>, transform_indices = @transform_2, window_bounds = array<i64: 1, 256>}, {pipeline_mode = #tpu.pipeline_mode<synchronous>, transform_indices = @transform_3, window_bounds = array<i64: 8, 8>}, {transform_indices = @transform_4, window_bounds = array<i64: 256, 128>}, {transform_indices = @transform_5, window_bounds = array<i64: 8, 128>}, {transform_indices = @transform_6, window_bounds = array<i64: 8, 128>}]} {
    %c0 = arith.constant 0 : index
    %c0_0 = arith.constant 0 : index
    %0 = vector.load %arg1[%c0, %c0_0] : memref<8x256xf32, #tpu.memory_space<vmem>>, vector<8x256xf32>
    %cst = arith.constant dense<0.000000e+00> : vector<8xf32>
    %1 = vector.multi_reduction <add>, %0, %cst [1] : vector<8x256xf32> to vector<8xf32>
    %2 = vector.shape_cast %1 : vector<8xf32> to vector<8x1xf32>
    %cst_1 = arith.constant 0.00510204071 : f32
    %3 = vector.broadcast %cst_1 : f32 to vector<8x1xf32>
    %4 = arith.mulf %2, %3 : vector<8x1xf32>
    %5 = tpu.iota {dimensions = array<i32: 1>} : vector<8x256xi32>
    %c196_i32 = arith.constant 196 : i32
    %6 = vector.broadcast %c196_i32 : i32 to vector<8x256xi32>
    %7 = arith.cmpi slt, %5, %6 : vector<8x256xi32>
    %8 = vector.broadcast %4 : vector<8x1xf32> to vector<8x256xf32>
    %9 = arith.subf %0, %8 : vector<8x256xf32>
    %cst_2 = arith.constant 0.000000e+00 : f32
    %10 = vector.broadcast %cst_2 : f32 to vector<8x256xf32>
    %11 = arith.select %7, %9, %10 : vector<8x256xi1>, vector<8x256xf32>
    %12 = arith.mulf %11, %11 : vector<8x256xf32>
    %cst_3 = arith.constant dense<0.000000e+00> : vector<8xf32>
    %13 = vector.multi_reduction <add>, %12, %cst_3 [1] : vector<8x256xf32> to vector<8xf32>
    %14 = vector.shape_cast %13 : vector<8xf32> to vector<8x1xf32>
    %cst_4 = arith.constant 0.00510204071 : f32
    %15 = vector.broadcast %cst_4 : f32 to vector<8x1xf32>
    %16 = arith.mulf %14, %15 : vector<8x1xf32>
    %cst_5 = arith.constant 9.99999974E-6 : f32
    %17 = vector.broadcast %cst_5 : f32 to vector<8x1xf32>
    %18 = arith.addf %16, %17 : vector<8x1xf32>
    %19 = math.rsqrt %18 : vector<8x1xf32>
    %20 = vector.broadcast %4 : vector<8x1xf32> to vector<8x256xf32>
    %21 = arith.subf %0, %20 : vector<8x256xf32>
    %22 = vector.broadcast %19 : vector<8x1xf32> to vector<8x256xf32>
    %23 = arith.mulf %21, %22 : vector<8x256xf32>
    %c0_6 = arith.constant 0 : index
    %c0_7 = arith.constant 0 : index
    %24 = vector.load %arg2[%c0_6, %c0_7] : memref<1x256xf32, #tpu.memory_space<vmem>>, vector<1x256xf32>
    %25 = vector.broadcast %24 : vector<1x256xf32> to vector<8x256xf32>
    %26 = arith.mulf %23, %25 : vector<8x256xf32>
    %c0_8 = arith.constant 0 : index
    %c0_9 = arith.constant 0 : index
    %27 = vector.load %arg3[%c0_8, %c0_9] : memref<1x256xf32, #tpu.memory_space<vmem>>, vector<1x256xf32>
    %28 = vector.broadcast %27 : vector<1x256xf32> to vector<8x256xf32>
    %29 = arith.addf %26, %28 : vector<8x256xf32>
    %c0_10 = arith.constant 0 : index
    %c0_11 = arith.constant 0 : index
    %30 = vector.load %arg5[%c0_10, %c0_11] : memref<256x128xf32, #tpu.memory_space<vmem>>, vector<256x128xf32>
    %cst_12 = arith.constant dense<0.000000e+00> : vector<8x128xf32>
    %31 = tpu.matmul %29, %30, %cst_12 {dimension_numbers = #tpu.dot_dimension_numbers<[1], [0], [0], [1], [0, 0, 1, 1], [], []>} : vector<8x256xf32>, vector<256x128xf32>, vector<8x128xf32> -> vector<8x128xf32>
    %c0_13 = arith.constant 0 : index
    %c0_14 = arith.constant 0 : index
    %32 = vector.load %arg4[%c0_13, %c0_14] : memref<8x8xf32, #tpu.memory_space<vmem>>, vector<8x8xf32>
    %cst_15 = arith.constant dense<0.000000e+00> : vector<8x128xf32>
    %33 = tpu.matmul %32, %31, %cst_15 {dimension_numbers = #tpu.dot_dimension_numbers<[1], [0], [0], [1], [0, 0, 1, 1], [], []>} : vector<8x8xf32>, vector<8x128xf32>, vector<8x128xf32> -> vector<8x128xf32>
    %c0_16 = arith.constant 0 : index
    %c0_17 = arith.constant 0 : index
    %34 = vector.load %arg6[%c0_16, %c0_17] : memref<8x128xf32, #tpu.memory_space<vmem>>, vector<8x128xf32>
    %35 = arith.addf %33, %34 : vector<8x128xf32>
    %c0_18 = arith.constant 0 : index
    %c0_19 = arith.constant 0 : index
    %36 = vector.load %arg7[%c0_18, %c0_19] : memref<8x128xf32, #tpu.memory_space<vmem>>, vector<8x128xf32>
    tpu.vector_store %arg7[%c0_18, %c0_19], %35 {strides = array<i32>} : memref<8x128xf32, #tpu.memory_space<vmem>>, vector<8x128xf32>,
    return
  }
  func.func @transform_0(%arg0: i32) -> (i32, i32) {
    %c0_i32 = arith.constant 0 : i32
    %c0_i32_0 = arith.constant 0 : i32
    %c0_i32_1 = arith.constant 0 : i32
    return %c0_i32, %c0_i32_0 : i32, i32
  }
  func.func @transform_1(%arg0: i32) -> (i32, i32) {
    %c0_i32 = arith.constant 0 : i32
    %c0_i32_0 = arith.constant 0 : i32
    %c0_i32_1 = arith.constant 0 : i32
    return %c0_i32, %c0_i32_0 : i32, i32
  }
  func.func @transform_2(%arg0: i32) -> (i32, i32) {
    %c0_i32 = arith.constant 0 : i32
    %c0_i32_0 = arith.constant 0 : i32
    %c0_i32_1 = arith.constant 0 : i32
    return %c0_i32, %c0_i32_0 : i32, i32
  }
  func.func @transform_3(%arg0: i32) -> (i32, i32) {
    %c0_i32 = arith.constant 0 : i32
    %c0_i32_0 = arith.constant 0 : i32
    %c0_i32_1 = arith.constant 0 : i32
    return %c0_i32, %c0_i32_0 : i32, i32
  }
  func.func @transform_4(%arg0: i32) -> (i32, i32) {
    %c0_i32 = arith.constant 0 : i32
    %c0_i32_0 = arith.constant 0 : i32
    return %c0_i32, %arg0 : i32, i32
  }
  func.func @transform_5(%arg0: i32) -> (i32, i32) {
    %c0_i32 = arith.constant 0 : i32
    %c0_i32_0 = arith.constant 0 : i32
    return %c0_i32, %arg0 : i32, i32
  }
  func.func @transform_6(%arg0: i32) -> (i32, i32) {
    %c0_i32 = arith.constant 0 : i32
    %c0_i32_0 = arith.constant 0 : i32
    return %c0_i32, %arg0 : i32, i32
  }
}

</mosaic_0001>

<bundles_post_ra>
// kernel: tpu_custom_call.1
= control target key start
LH: loop header
LB: loop body
LE: loop exit
PB: predicated region body
PF: predicated region fallthrough
CT: control target
= control target key end

     0   :  { %s1390_s0 = inlined_call_operand.hbm [shape: f32[8,256], index: 0, kind: input, shape index: {}]   ;;  %s1391_s1 = inlined_call_operand.vmem [shape: f32[1,256], index: 1, kind: input, shape index: {}]   ;;  %s1392_s2 = inlined_call_operand.hbm [shape: f32[1,256], index: 2, kind: input, shape index: {}]   ;;  %s1393_s3 = inlined_call_operand.hbm [shape: f32[8,8], index: 3, kind: input, shape index: {}]   ;;  %s1394_s4 = inlined_call_operand.hbm [shape: f32[256,256], index: 4, kind: input, shape index: {}]   ;;  %s1395_s5 = inlined_call_operand.vmem [shape: f32[8,256], index: 5, kind: input, shape index: {}]   ;;  %s1396_s6 = inlined_call_operand.hbm [shape: f32[8,256], index: 6, kind: output, shape index: {}]  }
   0x1   :  { %1402 = sst [smem:[#allocation16_spill]] %s1392_s2 }
   0x2   :  { %11 = vsyncpa [#allocation3], 0 }
   0x3   :  { %12 = vsyncpa [#allocation6], 0 }
   0x4   :  { %13 = vsyncpa [#allocation9], 0 }
   0x5   :  { %15 = vsyncpa [#allocation9 + $0x1], 0 }
   0x6   :  { %16 = vsyncpa [#allocation4], 0 }
   0x7   :  { %18 = vsyncpa [#allocation4 + $0x1], 0  ;;  %s1096_s21 = smov 0   ;;  %s1098_s22 = smov 0  }
   0x8   :  { %s1100_s23 = smov 0   ;;  %s1102_s24 = smov 0  }
   0x9 LB: > { %s1117_s25 = sadd.s32 4294967295, %s1049_s24   ;;  %s683_s26 = sadd.s32 4294967294, %s1049_s24   ;;  %s1049_s24 = sphi %s1102_s24, %s1428_s24   ;;  %s1045_s23 = sphi %s1100_s23, %s1427_s23   ;;  %s1041_s22 = sphi %s1098_s22, %s1426_s22   ;;  %s1037_s21 = sphi %s1096_s21, %s1425_s21  }
   0xa   : > { %s1121_s27 = sadd.s32 1, %s1049_s24   ;;  %s115_s28 = sadd.s32 1, %s1045_s23 }
   0xb   : > { %s112_s29 = ssub.s32 %s1049_s24, %s1121_s27  ;;  %p122_p0 = scmp.ne.s32.totalorder %s1045_s23, %s1041_s22 }
   0xc   : > { %p113_p1 = scmp.eq.s32.totalorder %s112_s29, 0  ;;  %p123_p2 = scmp.eq.s32.totalorder %s1049_s24, 0 }
   0xd   : > { %p128_p3 = scmp.ne.s32.totalorder %s1041_s22, %s1037_s21  ;;  %p1397_p4 = scmp.eq.s32.totalorder %s1117_s25, 0 }
   0xe   : > { %s1133_s30 = scalar_select %p113_p1, %s1045_s23, %s115_s28  }
   0xf   : > { %p1135_p5 = por %p123_p2, %p122_p0  ;;  %p1141_p6 = por %p1397_p4, %p128_p3 }
  0x10   : > { %1403 = sst [smem:[#allocation15_spill]] %s1133_s30  ;;  %p178_p7 = scmp.eq.s32.totalorder %s1117_s25, 1 }
  0x11   : > { %s1405_s8 = scalar_select %p1141_p6, 1, 0 }
  0x12   : > { %p184_p8 = scmp.eq.s32.totalorder %s683_s26, 1  ;;  %p684_p9 = scmp.ge.s32.totalorder %s1049_s24, 1 }
  0x13   : > { %p191_p10 = scmp.lt.s32.totalorder %s1049_s24, 3  ;;  %p1148_p11 = por %p178_p7, %p122_p0 }
  0x14   : > { %p1152_p12 = por %p184_p8, %p128_p3  ;;  %s1051_s12 = smov [#allocation5]  }
  0x15   : > { %s1406_s9 = scalar_select %p1148_p11, 1, 0 }
  0x16   : > { %s1407_s10 = scalar_select %p1152_p12, 1, 0 }
  0x17   : > { %p1156_p13 = pnand %p684_p9, %p191_p10  ;;  %s218_s13 = sshll.u32 %s1051_s12, 4  ;;  %s219_s13 = int_to_ptr.vmem [resolvable:$true] %s218_s13 }
  0x18   : > { %p814_p4 = scmp.lt.s32.totalorder %s1049_s24, 2  ;;  %p1409_p0 = scmp.eq.s32.totalorder %s1117_s25, 0 }
  0x19   : > { %s1408_s11 = scalar_select %p1156_p13, 1, 0 }
  0x1a   : > { %p793_p2 = pneg %p1156_p13  ;;  %p1172_p3 = pnand %p814_p4, %p1135_p5 }
  0x1b   : > { %s1052_s16 = smov [#allocation2]   ;;  %s1412_s2 = sld [smem:[#allocation16_spill]] }
  0x1c   : > { %p1166_p7 = pnand %p793_p2, %p1409_p0  ;;  %s204_s17 = sshll.u32 %s1052_s16, 4  ;;  %s1176_s17 = int_to_ptr.vmem [resolvable:$true] %s204_s17 }
  0x1d   : > { %s1411_s15 = scalar_select %p1172_p3, 1, 0 }
  0x1e   : > { %p1186_p9 = pneg %p1166_p7 }
  0x21   : > { %s861_s20 = scalar_lea.hbm %s1412_s2, 32 }
  0x22   : > { %p862_p8 = scmp.ne.s32.totalorder %s1412_s2, %s861_s20  ;;  %p868_p10 = scmp.lt.u32.totalorder %s861_s20, %s1412_s2 }
  0x24   : > { %p864_p4 = pnand %p1186_p9, %p862_p8 }
  0x26   : > { %p865_p5 = pneg %p864_p4 }
  0x28   : > { %p870_p2 = pnand %p868_p10, %p865_p5 }
  0x2a   : > { %873 = shalt.err (!%p870_p2)
}
  0x2b   : > { %s874_s16 = scalar_lea.vmem %s219_s13, 32  ;;  %p882_p11 = scmp.lt.s32.totalorder %s219_s13, %s219_s13 }
  0x2c   : > { %p875_p0 = scmp.ne.s32.totalorder %s219_s13, %s874_s16  ;;  %p883_p6 = scmp.lt.s32.totalorder %s874_s16, %s874_s16 }
  0x2e   : > { %p877_p1 = pnand %p875_p0, %p1186_p9  ;;  %p884_p13 = por %p883_p6, %p882_p11 }
  0x30   : > { %p878_p12 = pneg %p877_p1 }
  0x32   : > { %p885_p3 = pnand %p884_p13, %p878_p12 }
  0x34   : > { %888 = shalt.err (!%p885_p3)
}
  0x35   : > { %799 = dma.hbm_to_vmem [thread:$0]  (!%p1166_p7), %s1412_s2, 32, %s219_s13, [#allocation6]  }
  0x36   : > { %s889_s28 = scalar_lea.hbm %s1390_s0, 256 }
  0x37   : > { %p890_p1 = scmp.ne.s32.totalorder %s1390_s0, %s889_s28  ;;  %p896_p11 = scmp.lt.u32.totalorder %s889_s28, %s1390_s0 }
  0x39   : > { %p892_p8 = pnand %p890_p1, %p1186_p9 }
  0x3b   : > { %p893_p6 = pneg %p892_p8 }
  0x3d   : > { %p898_p12 = pnand %p896_p11, %p893_p6 }
  0x3f   : > { %901 = shalt.err (!%p898_p12)
}
  0x40   : > { %s902_s13 = scalar_lea.vmem %s1176_s17, 256  ;;  %p910_p5 = scmp.lt.s32.totalorder %s1176_s17, %s1176_s17 }
  0x41   : > { %p903_p13 = scmp.ne.s32.totalorder %s1176_s17, %s902_s13  ;;  %p911_p10 = scmp.lt.s32.totalorder %s902_s13, %s902_s13 }
  0x43   : > { %p905_p3 = pnand %p903_p13, %p1186_p9  ;;  %p912_p2 = por %p911_p10, %p910_p5 }
  0x45   : > { %p906_p4 = pneg %p905_p3 }
  0x47   : > { %p913_p0 = pnand %p912_p2, %p906_p4 }
  0x49   : > { %916 = shalt.err (!%p913_p0)
}
  0x4a   : > { %796 = dma.hbm_to_vmem [thread:$0]  (!%p1166_p7), %s1390_s0, 256, %s1176_s17, [#allocation3]  }
  0x4b   : > { %s1053_s19 = smov [#allocation7]   ;;  %s240_s26 = sand.u32 1, %s1045_s23  }
  0x4c   : > { %s229_s20 = sshll.u32 %s1053_s19, 4  ;;  %s917_s12 = scalar_lea.hbm %s1393_s3, 128  ;;  %s230_s20 = int_to_ptr.vmem [resolvable:$true] %s229_s20 }
  0x4d   : > { %p918_p1 = scmp.ne.s32.totalorder %s1393_s3, %s917_s12  ;;  %p924_p11 = scmp.lt.u32.totalorder %s917_s12, %s1393_s3 }
  0x4f   : > { %p920_p8 = pnand %p918_p1, %p1186_p9 }
  0x51   : > { %p921_p6 = pneg %p920_p8 }
  0x53   : > { %p926_p12 = pnand %p924_p11, %p921_p6 }
  0x55   : > { %929 = shalt.err (!%p926_p12)
}
  0x56   : > { %s930_s17 = scalar_lea.vmem %s230_s20, 128  ;;  %p938_p5 = scmp.lt.s32.totalorder %s230_s20, %s230_s20 }
  0x57   : > { %p931_p13 = scmp.ne.s32.totalorder %s230_s20, %s930_s17  ;;  %p939_p10 = scmp.lt.s32.totalorder %s930_s17, %s930_s17 }
  0x59   : > { %p933_p3 = pnand %p931_p13, %p1186_p9  ;;  %p940_p2 = por %p939_p10, %p938_p5 }
  0x5b   : > { %p934_p4 = pneg %p933_p3 }
  0x5d   : > { %p941_p0 = pnand %p940_p2, %p934_p4 }
  0x5f   : > { %944 = shalt.err (!%p941_p0)
}
  0x60   : > { %802 = dma.hbm_to_vmem [thread:$0]  (!%p1166_p7), %s1393_s3, 128, %s230_s20, [#allocation6]  }
  0x61   : > { %s689_s2 = sshll.u32 %s240_s26, 8  ;;  %s690_s28 = sshll.u32 %s1049_s24, 7 }
  0x62   : > { %s1248_s12 = scalar_lea.hbm %s1394_s4, %s690_s28  ;;  %s244_s16 = scalar_lea.vmem [#allocation8], %s689_s2 }
  0x63   : > { %s250_s14 = sshll.u32 %s244_s16, 4  ;;  %s1252_s13 = scalar_lea.sflag [#allocation9], %s240_s26  ;;  %s1250_s14 = int_to_ptr.vmem [resolvable:$true] %s250_s14 }
  0x64   : > { %s945_s30 = scalar_lea.hbm %s1248_s12, 4096  ;;  %p1414_p7 = scmp.ne.s32.totalorder %s1411_s15, 0 }
  0x65   : > { %p946_p9 = scmp.ne.s32.totalorder %s1248_s12, %s945_s30  ;;  %s950_s18 = scalar_lea.hbm %s1394_s4, 8192 }
  0x66   : > { %p947_p1 = pneg %p1414_p7  ;;  %p951_p11 = scmp.lt.u32.totalorder %s1248_s12, %s1394_s4 }
  0x67   : > { %p952_p12 = scmp.lt.u32.totalorder %s950_s18, %s945_s30  ;;  %p954_p3 = scmp.lt.u32.totalorder %s945_s30, %s1248_s12 }
  0x68   : > { %p948_p8 = pnand %p947_p1, %p946_p9 }
  0x69   : > { %p953_p13 = por %p952_p12, %p951_p11 }
  0x6a   : > { %p949_p6 = pneg %p948_p8 }
  0x6b   : > { %p955_p4 = por %p954_p3, %p953_p13 }
  0x6d   : > { %p956_p5 = pnand %p955_p4, %p949_p6 }
  0x6f   : > { %959 = shalt.err (!%p956_p5)
}
  0x70   : > { %s960_s26 = scalar_lea.vmem %s1250_s14, 4096  ;;  %s1054_s2 = smov [#allocation8]  }
  0x71   : > { %p961_p10 = scmp.ne.s32.totalorder %s1250_s14, %s960_s26  ;;  %s965_s7 = sshll.u32 %s1054_s2, 4  ;;  %s966_s7 = int_to_ptr.vmem [resolvable:$false] %s965_s7 }
  0x72   : > { %s967_s29 = scalar_lea.vmem %s966_s7, 8192  ;;  %p968_p9 = scmp.lt.s32.totalorder %s1250_s14, %s966_s7 }
  0x73   : > { %p963_p2 = pnand %p961_p10, %p947_p1  ;;  %p969_p8 = scmp.lt.s32.totalorder %s967_s29, %s960_s26 }
  0x75   : > { %p964_p0 = pneg %p963_p2  ;;  %p970_p11 = por %p969_p8, %p968_p9 }
  0x77   : > { %p971_p12 = pnand %p970_p11, %p964_p0 }
  0x79   : > { %974 = shalt.err (!%p971_p12)
}
  0x7a   : > { %s1055_s16 = smov 256   ;;  %s1056_s30 = smov 128  }
  0x7b   : > { %s1057_s20 = smov 8   ;;  %p1415_p1 = scmp.ne.s32.totalorder %s1408_s11, 0 }
  0x7c   : > { %806 = dma.hbm_to_vmem [thread:$0]  (!%p1414_p7), %s1248_s12, 4096, %s1250_s14, %s1252_s13, %s1055_s16, %s1056_s30, %s1057_s20  }
  0x7d   : > { %269 = sbr.rel (%p1415_p1) target bundleno = 902 (0x386), region = 44  ;;  %p1416_p6 = scmp.eq.s32.totalorder (!%p1415_p1), %s1117_s25, 0 }
  0x84   : > { %1020 = dma.done.wait (%p1416_p6), [#allocation3], 256   ;;  %p1417_p13 = pmov %p1416_p6 }
  0x85   : > { %p1418_p3 = pmov %p1416_p6 }
  0x86   : > { %1022 = vsyncadd (%p1417_p13), [#allocation3], 4294967040 }
  0x87   : > { %1024 = dma.done.wait (%p1418_p3), [#allocation6], 160   ;;  %p1419_p4 = pmov %p1418_p3 }
  0x88   : > { %s1291_s17 = sand.u32 1, %s1041_s22   ;;  %p1420_p7 = scmp.ne.s32.totalorder %s1405_s8, 0 }
  0x89   : > { %1026 = vsyncadd (%p1419_p4), [#allocation6], 4294967136  ;;  %s695_s11 = sshll.u32 %s1291_s17, 8  ;;  %s284_s15 = scalar_lea.sflag [#allocation9], %s1291_s17 }
  0x8a   : > { %s1295_s12 = scalar_lea.vmem [#allocation8], %s695_s11 }
  0x8b   : > { %1028 = dma.done.wait (%p1420_p7), %s284_s15, 4096  }
  0x8c   : > { %1030 = vsyncadd (%p1420_p7), %s284_s15, 4294963200  ;;  %v324_v0 = vld [vmem:[#allocation2] sm:$0xff]  ;;  %v325_v1 = vld [vmem:[#allocation2 + $0x8] sm:$0xff]  ;;  %v330_v21 = vlaneseq  ;;  %vm1059_vm1 = vmmov 0   ;;  %vm481_vm2 = vcmask 64512   ;;  %p320_p5 = scmp.lt.s32.totalorder %s1117_s25, 1 }
  0x8d   : > { %v326_v2 = vadd.f32 %v325_v1, %v324_v0  ;;  %v393_v3 = vld [vmem:[%s1295_s12 + $0x80] sm:$0xff]  ;;  %v394_v4 = vld [vmem:[%s1295_s12 + $0x88] sm:$0xff]  ;;  %v395_v8 = vld [vmem:[%s1295_s12 + $0x90] sm:$0xff]  ;;  %s696_s18 = sshll.u32 %s1291_s17, 3  ;;  %s700_s7 = sshll.u32 %s1117_s25, 7 }
  0x8e   : > { %v377_v5 = vld [vmem:[%s1295_s12] sm:$0xff]  ;;  %v745_v6 = vpack.c.bf16 %v394_v4, %v393_v3  ;;  %v378_v7 = vld [vmem:[%s1295_s12 + $0x8] sm:$0xff]  ;;  %v396_v9 = vld [vmem:[%s1295_s12 + $0x98] sm:$0xff]  ;;  %v331_v22 = vand.u32 127, %v330_v21  ;;  %s321_s13 = scalar_select %p320_p5, %s1117_s25, 1 }
  0x8f   : > { %327 = vadd.xlane.f32.xlu0 %v326_v2  ;;  %v747_v10 = vpack.c.bf16 %v378_v7, %v377_v5  ;;  %v749_v11 = vpack.c.bf16 %v396_v9, %v395_v8  ;;  %v379_v12 = vld [vmem:[%s1295_s12 + $0x10] sm:$0xff]  ;;  %v380_v13 = vld [vmem:[%s1295_s12 + $0x18] sm:$0xff]  ;;  %v397_v14 = vld [vmem:[%s1295_s12 + $0xa0] sm:$0xff]  ;;  %s319_s29 = scalar_lea.vmem [#allocation10], %s696_s18  ;;  %s1346_s11 = scalar_lea.hbm %s1396_s6, %s700_s7 }
  0x90   : > { %746 = vmatprep.subr.bf16.mxu0 %v745_v6  ;;  %v398_v15 = vld [vmem:[%s1295_s12 + $0xa8] sm:$0xff]  ;;  %v751_v16 = vpack.c.bf16 %v380_v13, %v379_v12  ;;  %v381_v18 = vld [vmem:[%s1295_s12 + $0x20] sm:$0xff]  ;;  %v332_v23 = vadd.s32 128, %v331_v22  ;;  %v399_v32 = vld [vmem:[%s1295_s12 + $0xb0] sm:$0xff]  ;;  %s697_s19 = sshll.u32 %s321_s13, 3  ;;  %s570_s16 = sshll.u32 %s319_s29, 4  ;;  %s1348_s16 = int_to_ptr.vmem [resolvable:$true] %s570_s16 }
  0x91   : > { %748 = vmatpush3.bf16.msra.mxu0 %v747_v10  ;;  %v753_v17 = vpack.c.bf16 %v398_v15, %v397_v14  ;;  %v382_v19 = vld [vmem:[%s1295_s12 + $0x28] sm:$0xff]  ;;  %v400_v33 = vld [vmem:[%s1295_s12 + $0xb8] sm:$0xff]  ;;  %v383_v35 = vld [vmem:[%s1295_s12 + $0x30] sm:$0xff]  ;;  %s323_s2 = scalar_lea.vmem %s1395_s5, %s697_s19  ;;  %s557_s15 = scalar_lea.sflag [#allocation4], %s1291_s17 }
  0x92   : > { %750 = vmatprep.subr.bf16.mxu0 %v749_v11  ;;  %v755_v20 = vpack.c.bf16 %v382_v19, %v381_v18  ;;  %vm334_vm0 = vcmp.lt.s32.totalorder %v332_v23, 196  ;;  %v757_v34 = vpack.c.bf16 %v400_v33, %v399_v32  ;;  %v384_v36 = vld [vmem:[%s1295_s12 + $0x38] sm:$0xff]  ;;  %v401_v38 = vld [vmem:[%s1295_s12 + $0xc0] sm:$0xff]  ;;  %v402_v39 = vld [vmem:[%s1295_s12 + $0xc8] sm:$0xff]  ;;  %p1421_p2 = scmp.ne.s32.totalorder %s1406_s9, 0  ;;  %s1060_s25 = smov [#allocation10]  }
  0x93   : > { %v759_v37 = vpack.c.bf16 %v384_v36, %v383_v35  ;;  %v761_v40 = vpack.c.bf16 %v402_v39, %v401_v38  ;;  %v385_v41 = vld [vmem:[%s1295_s12 + $0x40] sm:$0xff]  ;;  %v386_v42 = vld [vmem:[%s1295_s12 + $0x48] sm:$0xff]  ;;  %v403_v43 = vld [vmem:[%s1295_s12 + $0xd0] sm:$0xff]  ;;  %s979_s8 = sshll.u32 %s1060_s25, 4  ;;  %s980_s8 = int_to_ptr.vmem [resolvable:$false] %s979_s8 }
  0x94   : > { %v763_v44 = vpack.c.bf16 %v386_v42, %v385_v41  ;;  %v404_v45 = vld [vmem:[%s1295_s12 + $0xd8] sm:$0xff]  ;;  %v387_v46 = vld [vmem:[%s1295_s12 + $0x50] sm:$0xff]  ;;  %v405_v49 = vld [vmem:[%s1295_s12 + $0xe0] sm:$0xff]  ;;  %s981_s14 = scalar_lea.vmem %s980_s8, 256  ;;  %p982_p8 = scmp.lt.s32.totalorder %s1348_s16, %s980_s8 }
  0x95   : > { %752 = vmatpush3.bf16.msra.mxu0 %v751_v16  ;;  %v388_v47 = vld [vmem:[%s1295_s12 + $0x58] sm:$0xff]  ;;  %v765_v48 = vpack.c.bf16 %v404_v45, %v403_v43  ;;  %v406_v50 = vld [vmem:[%s1295_s12 + $0xe8] sm:$0xff]  ;;  %v389_v53 = vld [vmem:[%s1295_s12 + $0x60] sm:$0xff] }
  0x96   : > { %754 = vmatprep.subr.bf16.mxu0 %v753_v17  ;;  %v767_v51 = vpack.c.bf16 %v388_v47, %v387_v46  ;;  %v769_v52 = vpack.c.bf16 %v406_v50, %v405_v49  ;;  %v390_v54 = vld [vmem:[%s1295_s12 + $0x68] sm:$0xff]  ;;  %v407_v55 = vld [vmem:[%s1295_s12 + $0xf0] sm:$0xff]  ;;  %v408_v56 = vld [vmem:[%s1295_s12 + $0xf8] sm:$0xff]  ;;  %v1058_v17 = vmov 0.0  }
  0x97   : > { %v771_v57 = vpack.c.bf16 %v390_v54, %v389_v53  ;;  %v773_v58 = vpack.c.bf16 %v408_v56, %v407_v55  ;;  %v391_v59 = vld [vmem:[%s1295_s12 + $0x70] sm:$0xff]  ;;  %v392_v60 = vld [vmem:[%s1295_s12 + $0x78] sm:$0xff]  ;;  %v349_v4 = vld [vmem:[%s1391_s1] sm:$0x3]  ;;  %740 = vmatprep.subr.mxu1 %v1058_v17  ;;  %742 = vmatprep.mubr.msk.f32.mxu1 %vm1059_vm1, %v1058_v17  ;;  %s975_s12 = scalar_lea.vmem %s1348_s16, 128 }
  0x98   : > { %v775_v61 = vpack.c.bf16 %v392_v60, %v391_v59  ;;  %v363_v5 = vld [vmem:[#allocation5] sm:$0x3]  ;;  %v480_v22 = vld [vmem:[%s323_s2] sm:$0xff]  ;;  %p976_p10 = scmp.ne.s32.totalorder %s1348_s16, %s975_s12  ;;  %p983_p11 = scmp.lt.s32.totalorder %s981_s14, %s975_s12 }
  0x99   : > { %756 = vmatpush3.bf16.msra.mxu0 %v755_v20 }
  0x9a   : > { %758 = vmatprep.subr.bf16.mxu0 %v757_v34  ;;  %p977_p0 = pnand %p976_p10, %p1421_p2  ;;  %p984_p12 = por %p983_p11, %p982_p8 }
  0x9c   : > { %p978_p9 = pneg %p977_p0 }
  0x9d   : > { %760 = vmatpush3.bf16.msra.mxu0 %v759_v37 }
  0x9e   : > { %762 = vmatprep.subr.bf16.mxu0 %v761_v40  ;;  %p985_p1 = pnand %p984_p12, %p978_p9 }
  0xa1   : > { %764 = vmatpush3.bf16.msra.mxu0 %v763_v44 }
  0xa2   : > { %766 = vmatprep.subr.bf16.mxu0 %v765_v48 }
  0xa5   : > { %768 = vmatpush3.bf16.msra.mxu0 %v767_v51 }
  0xa6   : > { %770 = vmatprep.subr.bf16.mxu0 %v769_v52 }
  0xa9   : > { %772 = vmatpush3.bf16.msra.mxu0 %v771_v57 }
  0xaa   : > { %774 = vmatprep.subr.bf16.mxu0 %v773_v58 }
  0xad   : > { %776 = vmatpush3.bf16.msra.mxu0 %v775_v61 }
 0x11c   : > { %v328_v24 = vpop.xlane.xlu0 %327 }
 0x11d   : > { %v329_v25 = vmul.f32 0.0051020407, %v328_v24 }
 0x11f   : > { %v335_v26 = vsub.f32 %v324_v0, %v329_v25  ;;  %v336_v27 = vsub.f32 %v325_v1, %v329_v25  ;;  %v352_v1 = vshrl.u32 %v330_v21, 7  ;;  %v479_v21 = vld [vmem:[#allocation7] sm:$0xff] }
 0x121   : > { %v338_v28 = vsel %vm334_vm0, %v336_v27, 0.0  ;;  %v339_v29 = vmul.f32 %v335_v26, %v335_v26  ;;  %v353_v2 = vsub.s32 0, %v352_v1  ;;  %v357_v3 = vsub.s32 1, %v352_v1 }
 0x122   : > { %v340_v30 = vmul.f32 %v338_v28, %v338_v28 }
 0x123   : > { %v354_v6 = vrot.slane %v349_v4, %v353_v2  ;;  %v358_v7 = vrot.slane %v349_v4, %v357_v3  ;;  %v368_v10 = vrot.slane %v363_v5, %v353_v2  ;;  %v372_v11 = vrot.slane %v363_v5, %v357_v3 }
 0x124   : > { %v341_v31 = vadd.f32 %v340_v30, %v339_v29 }
 0x126   : > { %342 = vadd.xlane.f32.xlu0 %v341_v31 }
 0x1b3   : > { %v343_v62 = vpop.xlane.xlu0 %342 }
 0x1b4   : > { %v344_v63 = vmul.f32 0.0051020407, %v343_v62 }
 0x1b6   : > { %v345_v0 = vadd.f32 1e-05, %v344_v63 }
 0x1b8   : > { %859 = vrsqrt.f32 %v345_v0 }
 0x1c2   : > { %v860_v8 = vpop.eup %859 }
 0x1c3   : > { %v348_v9 = vmul.f32 %v860_v8, %v336_v27  ;;  %v347_v12 = vmul.f32 %v860_v8, %v335_v26 }
 0x1c5   : > { %v362_v13 = vmul.f32 %v358_v7, %v348_v9  ;;  %v361_v14 = vmul.f32 %v354_v6, %v347_v12 }
 0x1c7   : > { %v376_v15 = vadd.f32 %v372_v11, %v362_v13  ;;  %v375_v16 = vadd.f32 %v368_v10, %v361_v14 }
 0x1c9   : > { %473 = vmatprep.mubr.f32.mxu0 %v376_v15 }
 0x1ca   : > { %474 = vmatmul.mubr.f32.vlgmr.msra.gmra.mrb[0].mxu0 %v375_v16 }
 0x29d   : > { %v735_v18 = vpop.f32.mrb[0].mxu0 }
 0x29e   : > { %v736_v19 = vpop.f32.mrb[1].mxu0 }
 0x29f   : > { %v737_v20 = vadd.f32 %v736_v19, %v735_v18 }
 0x2a1   : > { %741 = vmatpush3.msra.mxu1 %v737_v20 }
 0x2a2   : > { %743 = vmatmul.mubr.msk.f32.vlgmr.msra.gmra.mrb[0].mxu1 %vm481_vm2, %v479_v21 }
 0x375   : > { %v551_v23 = vpop.f32.mrb[0].mxu1 }
 0x376   : > { %v552_v24 = vadd.f32 %v551_v23, %v480_v22  ;;  %v744_v25 = vpop.f32.mrb[1].mxu1 }
 0x378   : > { %555 = vst [vmem:[%s319_s29] sm:$0xff] %v552_v24 }
 0x379   : > { %988 = shalt.err (!%p985_p1)
}
 0x37a   : > { %s989_s17 = scalar_lea.hbm %s1346_s11, 128  ;;  %s993_s19 = scalar_lea.hbm %s1396_s6, 256 }
 0x37b   : > { %p990_p6 = scmp.ne.s32.totalorder %s1346_s11, %s989_s17  ;;  %p994_p4 = scmp.lt.u32.totalorder %s1346_s11, %s1396_s6 }
 0x37c   : > { %p995_p7 = scmp.lt.u32.totalorder %s993_s19, %s989_s17  ;;  %p997_p10 = scmp.lt.u32.totalorder %s989_s17, %s1346_s11 }
 0x37d   : > { %p991_p13 = pnand %p990_p6, %p1421_p2 }
 0x37e   : > { %p996_p5 = por %p995_p7, %p994_p4 }
 0x37f   : > { %p992_p3 = pneg %p991_p13 }
 0x380   : > { %p998_p0 = por %p997_p10, %p996_p5 }
 0x382   : > { %p999_p9 = pnand %p998_p0, %p992_p3 }
 0x384   : > { %1002 = shalt.err (!%p999_p9)
}
 0x385   : > { %791 = dma.vmem_to_hbm [thread:$0]  (%p1421_p2), %s1348_s16, 128, %s1346_s11, %s557_s15  }
 0x386 PF: > { %s582_s2 = sand.u32 1, %s1037_s21   ;;  %p1422_p8 = scmp.ne.s32.totalorder %s1407_s10, 0 }
 0x387   : > { %p1423_p11 = scmp.ge.s32.totalorder %s1049_s24, 2  ;;  %s583_s7 = scalar_lea.sflag [#allocation4], %s582_s2 }
 0x389   : > { %p808_p12 = pnand %p1423_p11, %p1422_p8 }
 0x38b   : > { %1032 = dma.done.wait (!%p808_p12), %s583_s7, 128  }
 0x38c   : > { %1034 = vsyncadd (!%p808_p12), %s583_s7, 4294967168  ;;  %s1424_s29 = sld [smem:[#allocation15_spill]]  ;;  %p21_p1 = scmp.ge.s32.totalorder %s1121_s27, 4  }
 0x38d   : > { %s1425_s21 = smov %s1041_s22  ;;  %s1426_s22 = smov %s1045_s23 }
 0x38e   : > { %s1428_s24 = smov %s1121_s27  ;;  %23 = sbr.rel (!%p21_p1) target bundleno = 9 (0x9), region = 105 }
 0x392   : > { %s1427_s23 = smov %s1424_s29 }
 0x395   :  { %588 = vsyncpa [#allocation3], 1 }
 0x396   :  { %590 = vsyncpa [#allocation3 + $0x1], 1 }
 0x397   :  { %591 = vsyncpa [#allocation6], 1 }
 0x398   :  { %592 = vsyncpa [#allocation9], 1 }
 0x399   :  { %594 = vsyncpa [#allocation9 + $0x1], 1 }
 0x39a   :  { %595 = vsyncpa [#allocation4], 1 }
 0x39b   :  { %597 = vsyncpa [#allocation4 + $0x1], 1 }

</bundles_post_ra>
